<compile_context>
chip_gen: v5e
topology: v5e:2x2
jax: 0.10.0
libtpu: 0.0.40
codegen_flags: <defaults>
</compile_context>

<pallas_src>
import math

import jax
import jax.numpy as jnp
import numpy as np
from jax.experimental import pallas as pl
from jax.experimental.pallas import tpu as pltpu


# --------------------------------------------------------------------------- #
# Kernels
# --------------------------------------------------------------------------- #

def _channel_attention(m, w_ref, out_dtype):
    """sigmoid(Conv1d(1,1,k,'same',no-bias)(m)) along the channel axis.

    m: (Bt, C) float32 pooled means with C on the lane axis.  The k-tap
    cross-correlation with zero 'same' padding matches PyTorch Conv1d.  Data is
    tiny (Bt x C), so the lane shifts ride the otherwise-idle XLU slot.
    """
    Bt, C = m.shape
    k = w_ref.shape[0]
    half = k // 2
    if half > 0:
        pad = jnp.zeros((Bt, half), jnp.float32)
        m = jnp.concatenate([pad, m, pad], axis=-1)         # (Bt, C + 2*half)
    acc = w_ref[0] * m[:, 0:C]
    for j in range(1, k):                                   # static unroll, k is 3/5
        acc = acc + w_ref[j] * m[:, j:j + C]
    return jax.nn.sigmoid(acc).astype(out_dtype)            # cast the tiny scale once


def _eca_kernel_nchw(w_ref, x_ref, o_ref):
    # w_ref: SMEM (k,) f32.  x_ref/o_ref: VMEM (Bt, C, HW), spatial on lanes.
    m = jnp.mean(x_ref[...], axis=-1, dtype=jnp.float32)    # (Bt, C), f32 accumulation
    scale = _channel_attention(m, w_ref, x_ref.dtype)       # (Bt, C) in I/O dtype
    # Gating multiply in the I/O dtype -> no block-sized f32 temporary.
    o_ref[...] = x_ref[...] * scale[:, :, None]


def _eca_kernel_nhwc(w_ref, x_ref, o_ref):
    # w_ref: SMEM (k,) f32.  x_ref/o_ref: VMEM (Bt, HW, C), channels on lanes.
    m = jnp.mean(x_ref[...], axis=1, dtype=jnp.float32)     # (Bt, C), C stays on lanes
    scale = _channel_attention(m, w_ref, x_ref.dtype)       # (Bt, C) in I/O dtype
    # C stays on lanes end-to-end: no relayout, lane-dense store.
    o_ref[...] = x_ref[...] * scale[:, None, :]


# --------------------------------------------------------------------------- #
# Planning helpers (generation-aware tiling / VMEM budget)
# --------------------------------------------------------------------------- #

def _tpu_caps():
    """Returns (vmem_capacity_bytes, multi_core) with conservative fallbacks."""
    vmem_cap = 128 << 20
    try:
        info = pltpu.get_tpu_info()
        vmem_cap = int(getattr(info, "vmem_capacity_bytes", vmem_cap))
    except Exception:
        pass
    # v7x-like: 64 MiB VMEM per TensorCore, 2 TensorCores per chip.
    multi_core = vmem_cap <= (64 << 20)
    return vmem_cap, multi_core


def _pick_batch_tile(B, per_batch_bytes, target_block_bytes, multi_core):
    bt = int(max(1, min(B, target_block_bytes // max(per_batch_bytes, 1))))
    # Only a multi-TensorCore chip (v7x) needs >= 2 grid steps to feed its second
    # core via the "parallel" batch axis -- and only if halving the block keeps it
    # above the ~2 MiB roofline knee.
    if multi_core and B >= 2:
        clamped = max(1, min(bt, B // 2))
        if clamped == bt or clamped * per_batch_bytes >= (2 << 20):
            bt = clamped
    # Prefer an exact divisor of B near the target; otherwise accept a ragged
    # tail block (grid uses cdiv; batch rows are independent, so the undefined
    # padded rows in the tail block are simply not written back).
    for d in range(bt, 0, -1):
        if B % d == 0:
            if 2 * d >= bt:
                return d
            break
    return bt


def _plan(B, per_batch_bytes):
    vmem_cap, multi_core = _tpu_caps()
    # v7x's ~3.2 TB/s HBM needs ~2x larger blocks than v6e to hide the ~0.35 us
    # per-grid-step overhead at the same roofline fraction.
    target_block_bytes = (7 << 20) if multi_core else (4 << 20)
    bt = _pick_batch_tile(B, per_batch_bytes, target_block_bytes, multi_core)
    block_bytes = bt * per_batch_bytes
    # Double-buffered input + output blocks + slack.  The kernel no longer makes
    # block-sized f32 copies, so this estimate is tight.  Clamp to ~60% of
    # physical VMEM (v7x: 64 MiB/TC -> ~38 MiB; v5e/v6e: 128 MiB -> ~76 MiB).
    vmem_limit = int(min(max(4 * block_bytes + (2 << 20), 16 << 20),
                         (vmem_cap * 3) // 5))
    return bt, vmem_limit


def _eca_call(kernel, x3, weight, bt, vmem_limit, donate):
    B = x3.shape[0]
    block_shape = (bt,) + x3.shape[1:]
    extra = {"input_output_aliases": {1: 0}} if donate else {}
    return pl.pallas_call(
        kernel,
        out_shape=jax.ShapeDtypeStruct(x3.shape, x3.dtype),
        grid=(pl.cdiv(B, bt),),
        in_specs=[
            pl.BlockSpec(memory_space=pltpu.MemorySpace.SMEM),   # conv taps
            pl.BlockSpec(block_shape, lambda b: (b, 0, 0)),      # activations
        ],
        out_specs=pl.BlockSpec(block_shape, lambda b: (b, 0, 0)),
        compiler_params=pltpu.CompilerParams(
            dimension_semantics=("parallel",),
            vmem_limit_bytes=vmem_limit),
        **extra,
    )(weight.astype(jnp.float32), x3)


# --------------------------------------------------------------------------- #
# Public entry points
# --------------------------------------------------------------------------- #

def eca_forward(x, weight, *, donate=False):
    """NCHW entry point (matches the PyTorch module).  x: (B, C, H, W)."""
    B, C, H, W = x.shape
    HW = H * W
    x3 = x.reshape(B, C, HW)                 # free reshape; spatial on lanes
    bt, vmem_limit = _plan(B, C * HW * jnp.dtype(x.dtype).itemsize)
    out = _eca_call(_eca_kernel_nchw, x3, weight, bt, vmem_limit, donate)
    return out.reshape(B, C, H, W)


def eca_forward_nhwc(x, weight, *, donate=False):
    """Channels-last entry point.  x: (B, H, W, C) or (B, HW, C).

    Keeps C on the lane axis so DMAs and stores stay lane-dense for the common
    deep-layer ECA shapes where H*W is 49/196/784 but C % 128 == 0.  Use this at
    call sites that already hold channels-last activations.
    """
    if x.ndim == 4:
        B, H, W, C = x.shape
        x3 = x.reshape(B, H * W, C)
    else:
        B, HW, C = x.shape
        x3 = x
    bt, vmem_limit = _plan(B, x3.shape[1] * C * jnp.dtype(x.dtype).itemsize)
    out = _eca_call(_eca_kernel_nhwc, x3, weight, bt, vmem_limit, donate)
    return out.reshape(x.shape)


# --------------------------------------------------------------------------- #
# Reference & test harness
# --------------------------------------------------------------------------- #

def _eca_kernel_size(c, b=1, gamma=2):
    t = int(abs((math.log(c, 2) + b) / gamma))
    return t if t % 2 else t + 1


def eca_reference(x, weight):
    """Pure-JAX reference mirroring the PyTorch forward (compute in f32). NCHW."""
    k = weight.shape[0]
    half = k // 2
    B, C, H, W = x.shape
    xf = x.astype(jnp.float32)
    y = jnp.mean(xf, axis=(2, 3))                      # (B, C)
    yp = jnp.pad(y, ((0, 0), (half, half)))            # zero "same" padding
    conv = jnp.zeros_like(y)
    for j in range(k):
        conv = conv + weight[j] * yp[:, j:j + C]
    s = jax.nn.sigmoid(conv)                           # (B, C)
    return (xf * s[:, :, None, None]).astype(x.dtype)


if __name__ == "__main__":
    key = jax.random.PRNGKey(0)
    kx, kw, kx2 = jax.random.split(key, 3)

    # --- NCHW path (module layout); C = 16 -> k = 3, HW = 256 (lane-dense) ---
    B, C, H, W = 4, 16, 16, 16
    k = _eca_kernel_size(C)
    x = jax.random.normal(kx, (B, C, H, W), dtype=jnp.float32)
    weight = jax.random.normal(kw, (k,), dtype=jnp.float32) * 0.5

    out = eca_forward(x, weight)
    jax.block_until_ready(out)
    np.testing.assert_allclose(np.asarray(out),
                               np.asarray(eca_reference(x, weight)),
                               rtol=1e-5, atol=1e-5)

    # bf16 I/O: pooling/conv/sigmoid stay f32; gating multiply runs in bf16.
    x_bf = x.astype(jnp.bfloat16)
    out_bf = eca_forward(x_bf, weight)
    jax.block_until_ready(out_bf)
    np.testing.assert_allclose(
        np.asarray(out_bf.astype(jnp.float32)),
        np.asarray(eca_reference(x_bf, weight).astype(jnp.float32)),
        rtol=5e-2, atol=5e-2)

    # --- channels-last path: HW = 49 (not lane-aligned) but C = 128 -> k = 5 ---
    Bc, Hc, Wc, Cc = 2, 7, 7, 128
    kc = _eca_kernel_size(Cc)
    wc = jax.random.normal(kw, (kc,), dtype=jnp.float32) * 0.5
    x_cl = jax.random.normal(kx2, (Bc, Hc, Wc, Cc), dtype=jnp.bfloat16)
    out_cl = eca_forward_nhwc(x_cl, wc)
    jax.block_until_ready(out_cl)
    ref_cl = jnp.transpose(
        eca_reference(jnp.transpose(x_cl, (0, 3, 1, 2)), wc), (0, 2, 3, 1))
    np.testing.assert_allclose(
        np.asarray(out_cl.astype(jnp.float32)),
        np.asarray(ref_cl.astype(jnp.float32)),
        rtol=5e-2, atol=5e-2)

    print("KERNEL_OK")
</pallas_src>

<mosaic_0001>
module attributes {stable_mosaic.version = 11 : i64} {
  func.func @_eca_kernel_nchw(%arg0: i32, %arg1: memref<3xf32, #tpu.memory_space<smem>>, %arg2: memref<4x16x256xf32, #tpu.memory_space<vmem>>, %arg3: memref<4x16x256xf32, #tpu.memory_space<vmem>>) attributes {dimension_semantics = [#tpu.dimension_semantics<parallel>], iteration_bounds = array<i64: 1>, scalar_prefetch = 0 : i64, scratch_operands = 0 : i64, tpu.core_type = #tpu.core_type<tc>, window_params = [{transform_indices = @transform_0, window_bounds = array<i64: 3>}, {transform_indices = @transform_1, window_bounds = array<i64: 4, 16, 256>}, {transform_indices = @transform_2, window_bounds = array<i64: 4, 16, 256>}]} {
    %c0 = arith.constant 0 : index
    %c0_0 = arith.constant 0 : index
    %c0_1 = arith.constant 0 : index
    %0 = vector.load %arg2[%c0, %c0_0, %c0_1] : memref<4x16x256xf32, #tpu.memory_space<vmem>>, vector<4x16x256xf32>
    %cst = arith.constant dense<0.000000e+00> : vector<4x16xf32>
    %1 = vector.multi_reduction <add>, %0, %cst [2] : vector<4x16x256xf32> to vector<4x16xf32>
    %cst_2 = arith.constant 2.560000e+02 : f32
    %2 = vector.broadcast %cst_2 : f32 to vector<4x16xf32>
    %3 = arith.divf %1, %2 : vector<4x16xf32>
    %cst_3 = arith.constant 0.000000e+00 : f32
    %4 = vector.broadcast %cst_3 : f32 to vector<4x1xf32>
    %5 = tpu.concatenate %4, %3, %4 in 1 : vector<4x1xf32>, vector<4x16xf32>, vector<4x1xf32> -> vector<4x18xf32>
    %c0_4 = arith.constant 0 : index
    %6 = memref.load %arg1[%c0_4] : memref<3xf32, #tpu.memory_space<smem>>
    %7 = vector.extract_strided_slice %5 {offsets = [0, 0], sizes = [4, 16], strides = [1, 1]} : vector<4x18xf32> to vector<4x16xf32>
    %8 = vector.broadcast %6 : f32 to vector<4x16xf32>
    %9 = arith.mulf %8, %7 : vector<4x16xf32>
    %c1 = arith.constant 1 : index
    %10 = memref.load %arg1[%c1] : memref<3xf32, #tpu.memory_space<smem>>
    %11 = vector.extract_strided_slice %5 {offsets = [0, 1], sizes = [4, 16], strides = [1, 1]} : vector<4x18xf32> to vector<4x16xf32>
    %12 = vector.broadcast %10 : f32 to vector<4x16xf32>
    %13 = arith.mulf %12, %11 : vector<4x16xf32>
    %14 = arith.addf %9, %13 : vector<4x16xf32>
    %c2 = arith.constant 2 : index
    %15 = memref.load %arg1[%c2] : memref<3xf32, #tpu.memory_space<smem>>
    %16 = vector.extract_strided_slice %5 {offsets = [0, 2], sizes = [4, 16], strides = [1, 1]} : vector<4x18xf32> to vector<4x16xf32>
    %17 = vector.broadcast %15 : f32 to vector<4x16xf32>
    %18 = arith.mulf %17, %16 : vector<4x16xf32>
    %19 = arith.addf %14, %18 : vector<4x16xf32>
    %20 = arith.negf %19 : vector<4x16xf32>
    %21 = math.exp %20 : vector<4x16xf32>
    %cst_5 = arith.constant 1.000000e+00 : f32
    %22 = vector.broadcast %cst_5 : f32 to vector<4x16xf32>
    %23 = arith.addf %22, %21 : vector<4x16xf32>
    %24 = arith.divf %22, %23 : vector<4x16xf32>
    %c0_6 = arith.constant 0 : index
    %c0_7 = arith.constant 0 : index
    %c0_8 = arith.constant 0 : index
    %25 = vector.load %arg2[%c0_6, %c0_7, %c0_8] : memref<4x16x256xf32, #tpu.memory_space<vmem>>, vector<4x16x256xf32>
    %26 = vector.shape_cast %24 : vector<4x16xf32> to vector<4x16x1xf32>
    %27 = vector.broadcast %26 : vector<4x16x1xf32> to vector<4x16x256xf32>
    %28 = arith.mulf %25, %27 : vector<4x16x256xf32>
    %c0_9 = arith.constant 0 : index
    %c0_10 = arith.constant 0 : index
    %c0_11 = arith.constant 0 : index
    %29 = vector.load %arg3[%c0_9, %c0_10, %c0_11] : memref<4x16x256xf32, #tpu.memory_space<vmem>>, vector<4x16x256xf32>
    tpu.vector_store %arg3[%c0_9, %c0_10, %c0_11], %28 {strides = array<i32>} : memref<4x16x256xf32, #tpu.memory_space<vmem>>, vector<4x16x256xf32>,
    return
  }
  func.func @transform_0(%arg0: i32) -> i32 {
    %c0_i32 = arith.constant 0 : i32
    %c0_i32_0 = arith.constant 0 : i32
    return %c0_i32 : i32
  }
  func.func @transform_1(%arg0: i32) -> (i32, i32, i32) {
    %c0_i32 = arith.constant 0 : i32
    %c0_i32_0 = arith.constant 0 : i32
    %c0_i32_1 = arith.constant 0 : i32
    return %arg0, %c0_i32, %c0_i32_0 : i32, i32, i32
  }
  func.func @transform_2(%arg0: i32) -> (i32, i32, i32) {
    %c0_i32 = arith.constant 0 : i32
    %c0_i32_0 = arith.constant 0 : i32
    %c0_i32_1 = arith.constant 0 : i32
    return %arg0, %c0_i32, %c0_i32_0 : i32, i32, i32
  }
}

</mosaic_0001>

<bundles_post_ra>
// kernel: tpu_custom_call.1
= control target key start
LH: loop header
LB: loop body
LE: loop exit
PB: predicated region body
PF: predicated region fallthrough
CT: control target
= control target key end

     0   :  { %7 = vsyncpa [#allocation5], 0  ;;  %s467_s0 = inlined_call_operand.hbm [shape: f32[3], index: 0, kind: input, shape index: {}]   ;;  %s468_s1 = inlined_call_operand.hbm [shape: f32[4,16,256], index: 1, kind: input, shape index: {}]   ;;  %s469_s2 = inlined_call_operand.hbm [shape: f32[4,16,256], index: 2, kind: output, shape index: {}]  }
   0x1   :  { %8 = vsyncpa [#allocation3], 0 }
   0x2   :  { %9 = vsyncpa [#allocation4], 0  ;;  %s15_s11 = sshll.u32 %s467_s0, 4  ;;  %s23_s14 = sshll.u32 %s468_s1, 4  ;;  %s16_s11 = int_to_ptr.hbm [resolvable:$true] %s15_s11  ;;  %s24_s14 = int_to_ptr.hbm [resolvable:$true] %s23_s14 }
   0x3   :  { %s361_s15 = smov [#allocation2]   ;;  %s362_s16 = smov [#allocation6]  }
   0x4   :  { %18 = dma.hbm_to_smem %s16_s11, 16, %s361_s15, [#allocation5]  }
   0x5   :  { %s25_s17 = sshll.u32 %s362_s16, 4  ;;  %s363_s18 = smov 256   ;;  %s26_s17 = int_to_ptr.vmem [resolvable:$true] %s25_s17 }
   0x6   :  { %s364_s19 = smov 16  }
   0x7   :  { %31 = dma.hbm_to_vmem [thread:$0]  %s24_s14, 2048, %s26_s17, [#allocation3], %s363_s18, %s363_s18, %s364_s19  }
   0x8   :  { %355 = dma.done.wait [#allocation5], 16  }
   0x9   :  { %356 = vsyncadd [#allocation5], 4294967280 }
   0xa   :  { %357 = dma.done.wait [#allocation3], 2048  }
   0xb   :  { %358 = vsyncadd [#allocation3], 4294965248 }
   0xc   :  { %40 = sfence }
   0xd   :  { %v393_v0 = vld [vmem:[#allocation6 + $0x40] sm:$0xff]  ;;  %v395_v1 = vld [vmem:[#allocation6 + $0x48] sm:$0xff]  ;;  %v411_v9 = vld [vmem:[#allocation6 + $0x50] sm:$0xff]  ;;  %v365_v24 = vmov 256.0   ;;  %v104_v30 = vlaneseq  ;;  %vm110_vm1 = vcmask 138312   ;;  %s275_s0 = sld [smem:[#allocation2 + $0x2]] }
   0xe   :  { %v397_v2 = vld [vmem:[#allocation6 + $0x20] sm:$0xff]  ;;  %v69_v3 = vadd.f32 %v395_v1, %v393_v0  ;;  %v401_v4 = vld [vmem:[#allocation6 + $0x28] sm:$0xff]  ;;  %v413_v10 = vld [vmem:[#allocation6 + $0x58] sm:$0xff]  ;;  %289 = vrcp.f32 %v365_v24  ;;  %s274_s1 = sld [smem:[#allocation2 + $0x1]]  ;;  %vm121_vm2 = vcmask 1041409   ;;  %vm123_vm3 = vcmask 1042434  }
   0xf   :  { %v403_v5 = vld [vmem:[#allocation6] sm:$0xff]  ;;  %v405_v6 = vld [vmem:[#allocation6 + $0x8] sm:$0xff]  ;;  %v63_v7 = vadd.f32 %v401_v4, %v397_v2  ;;  %v415_v11 = vld [vmem:[#allocation6 + $0x30] sm:$0xff]  ;;  %v72_v15 = vadd.f32 %v413_v10, %v411_v9  ;;  %v105_v34 = vand.u32 127, %v104_v30  ;;  %vm125_vm4 = vcmask 1043459   ;;  %s366_s20 = smov 126  }
  0x10   :  { %v57_v8 = vadd.f32 %v405_v6, %v403_v5  ;;  %70 = vadd.xlane.f32.xlu2 %v69_v3  ;;  %v417_v12 = vld [vmem:[#allocation6 + $0x38] sm:$0xff]  ;;  %v419_v13 = vld [vmem:[#allocation6 + $0x10] sm:$0xff]  ;;  %v433_v20 = vld [vmem:[#allocation6 + $0x60] sm:$0xff]  ;;  %vm128_vm5 = vcmask 7168   ;;  %vm130_vm6 = vcmask 138240   ;;  %s367_s21 = smov 127  }
  0x11   :  { %64 = vadd.xlane.f32.xlu1 %v63_v7  ;;  %v421_v14 = vld [vmem:[#allocation6 + $0x18] sm:$0xff]  ;;  %v66_v16 = vadd.f32 %v417_v12, %v415_v11  ;;  %v429_v18 = vld [vmem:[#allocation6 + $0x70] sm:$0xff]  ;;  %v435_v21 = vld [vmem:[#allocation6 + $0x68] sm:$0xff]  ;;  %v108_v36 = vadd.s32 4294967287, %v105_v34  ;;  %v106_v38 = vadd.s32 4294967295, %v105_v34  ;;  %s132_s22 = sld [smem:[#allocation2]] }
  0x12   :  { %58 = vadd.xlane.f32.xlu0 %v57_v8  ;;  %v60_v17 = vadd.f32 %v421_v14, %v419_v13  ;;  %v431_v19 = vld [vmem:[#allocation6 + $0x78] sm:$0xff]  ;;  %v75_v23 = vadd.f32 %v435_v21, %v433_v20  ;;  %v172_v24 = vshrl.u32 %v104_v30, 7  ;;  %s368_s23 = smov [#allocation7]   ;;  %s260_s27 = sshll.u32 %s469_s2, 4  ;;  %s261_s27 = int_to_ptr.hbm [resolvable:$true] %s260_s27 }
  0x13   :  { %v78_v22 = vadd.f32 %v431_v19, %v429_v18  ;;  %v144_v8 = vstv %s275_s0  ;;  %s258_s24 = sshll.u32 %s368_s23, 4  ;;  %s259_s24 = int_to_ptr.vmem [resolvable:$true] %s258_s24 }
  0x14   :  { %v290_v25 = vpop.eup %289  ;;  %287 = vset.pattern.permute.xlu0 %v172_v24  ;;  %285 = vset.pattern.permute.xlu1 %v172_v24 }
  0x15   :  { %v82_v26 = vmul.f32 256.0, %v290_v25  ;;  %vm86_vm0 = vweird.f32 %v290_v25 }
  0x17   :  { %v83_v27 = vsub.f32 1.0, %v82_v26  ;;  %v133_v26 = vstv %s132_s22 }
  0x18   :  { %73 = vadd.xlane.f32.xlu2 %v72_v15  ;;  %v136_v15 = vstv %s274_s1 }
  0x19   :  { %67 = vadd.xlane.f32.xlu1 %v66_v16  ;;  %v84_v28 = vmul.f32 %v290_v25, %v83_v27 }
  0x1a   :  { %61 = vadd.xlane.f32.xlu0 %v60_v17 }
  0x1b   :  { %v85_v33 = vadd.f32 %v290_v25, %v84_v28 }
  0x1d   :  { %v87_v35 = vsel %vm86_vm0, %v290_v25, %v85_v33  ;;  %v179_v25 = vadd.s32 8, %v172_v24 }
  0x1f   :  { %286 = vset.pattern.permute.xlu2 %v179_v25 }
  0x21   :  { %79 = vadd.xlane.f32.xlu1 %v78_v22 }
  0x22   :  { %76 = vadd.xlane.f32.xlu0 %v75_v23 }
  0x83   :  { %v71_v29 = vpop.xlane.xlu2 %70 }
  0x84   :  { %v65_v31 = vpop.xlane.xlu1 %64  ;;  %v92_v45 = vmul.f32 %v87_v35, %v71_v29 }
  0x85   :  { %v59_v32 = vpop.xlane.xlu0 %58  ;;  %v90_v41 = vmul.f32 %v87_v35, %v65_v31 }
  0x86   :  { %v88_v42 = vmul.f32 %v87_v35, %v59_v32  ;;  %v115_v51 = vperm.slane %v92_v45, %v106_v38 }
  0x87   :  { %v112_v49 = vperm.slane %v90_v41, %v106_v38 }
  0x88   :  { %v107_v50 = vperm.slane %v88_v42, %v106_v38 }
  0x8b   :  { %v74_v37 = vpop.xlane.xlu2 %73 }
  0x8c   :  { %v68_v39 = vpop.xlane.xlu1 %67  ;;  %v93_v46 = vmul.f32 %v87_v35, %v74_v37 }
  0x8d   :  { %v62_v40 = vpop.xlane.xlu0 %61  ;;  %v91_v43 = vmul.f32 %v87_v35, %v68_v39 }
  0x8e   :  { %v89_v44 = vmul.f32 %v87_v35, %v62_v40  ;;  %v116_v52 = vperm.slane %v93_v46, %v108_v36 }
  0x8f   :  { %v113_v47 = vperm.slane %v91_v43, %v108_v36 }
  0x90   :  { %v109_v48 = vperm.slane %v89_v44, %v108_v36  ;;  %v117_v59 = vsel %vm110_vm1, %v116_v52, %v115_v51 }
  0x91   :  { %v114_v53 = vsel %vm110_vm1, %v113_v47, %v112_v49 }
  0x92   :  { %v111_v54 = vsel %vm110_vm1, %v109_v48, %v107_v50 }
  0x93   :  { %v122_v60 = vsel %vm121_vm2, %v114_v53, %v111_v54 }
  0x94   :  { %v80_v55 = vpop.xlane.xlu1 %79  ;;  %v124_v3 = vsel %vm123_vm3, %v117_v59, %v122_v60 }
  0x95   :  { %v77_v56 = vpop.xlane.xlu0 %76  ;;  %v95_v57 = vmul.f32 %v87_v35, %v80_v55 }
  0x96   :  { %v94_v58 = vmul.f32 %v87_v35, %v77_v56 }
  0x97   :  { %v119_v61 = vperm.slane %v95_v57, %v108_v36 }
  0x98   :  { %v118_v62 = vperm.slane %v94_v58, %v106_v38 }
  0x9a   :  { %v120_v63 = vsel %vm110_vm1, %v119_v61, %v118_v62 }
  0x9b   :  { %v126_v7 = vsel %vm125_vm4, %v120_v63, %v124_v3 }
  0x9c   :  { %v129_v16 = vsel %vm128_vm5, 0.0, %v126_v7 }
  0x9d   :  { %v131_v17 = vsel %vm130_vm6, %v129_v16, 0.0 }
  0x9e   :  { %v145_v22 = vmul.f32 %v144_v8, %v131_v17  ;;  %v137_v23 = vmul.f32 %v136_v15, %v131_v17  ;;  %v134_v28 = vmul.f32 %v133_v26, %v131_v17 }
  0xa0   :  { %147 = vrot.lane.b32.xlu0 %v145_v22, %s366_s20  ;;  %139 = vrot.lane.b32.xlu2 %v137_v23, %s367_s21 }
  0xfa   :  { %v140_v27 = vpop.permute.xlu2 %139 }
  0xfb   :  { %v142_v29 = vadd.f32 %v140_v27, %v134_v28 }
 0x112   :  { %v148_v31 = vpop.permute.xlu0 %147 }
 0x113   :  { %v150_v32 = vadd.f32 %v148_v31, %v142_v29 }
 0x115   :  { %v276_v33 = vmul.f32 -1.442695, %v150_v32 }
 0x117   :  { %291 = vpow2.f32 %v276_v33 }
 0x11d   :  { %v292_v34 = vpop.eup %291 }
 0x11e   :  { %v154_v35 = vadd.f32 1.0, %v292_v34 }
 0x120   :  { %293 = vrcp.f32 %v154_v35  ;;  %v166_v39 = vand.u32 2147483648, %v154_v35  ;;  %v164_v40 = vand.u32 2147483647, %v154_v35  ;;  %vm160_vm8 = vweird.f32 %v154_v35 }
 0x122   :  { %v167_v42 = vor.u32 1.1754944e-38, %v166_v39  ;;  %vm165_vm10 = vcmp.eq.f32.partialorder %v164_v40, 8.507059e+37 }
 0x126   :  { %v294_v36 = vpop.eup %293 }
 0x127   :  { %v156_v37 = vmul.f32 %v294_v36, %v154_v35  ;;  %vm161_vm7 = vweird.f32 %v294_v36 }
 0x128   :  { %vm162_vm9 = vmor %vm160_vm8, %vm161_vm7 }
 0x129   :  { %v157_v38 = vsub.f32 1.0, %v156_v37 }
 0x12b   :  { %v158_v30 = vmul.f32 %v294_v36, %v157_v38 }
 0x12d   :  { %v159_v41 = vadd.f32 %v294_v36, %v158_v30 }
 0x12f   :  { %v163_v43 = vsel %vm162_vm9, %v294_v36, %v159_v41 }
 0x130   :  { %v168_v44 = vsel %vm165_vm10, %v167_v42, %v163_v43 }
 0x131   :  { %v183_v45 = vperm.slane %v168_v44, 1  ;;  %v170_v46 = vperm.slane %v168_v44, 0  ;;  %v196_v47 = vperm.slane %v168_v44, 2  ;;  %v209_v48 = vperm.slane %v168_v44, 3 }
 0x133   :  { %188 = vperm.xlu0 %287, %v183_v45   ;;  %181 = vperm.xlu2 %286, %v170_v46  }
 0x134   :  { %175 = vperm.xlu1 %285, %v170_v46  }
 0x13b   :  { %288 = vset.pattern.permute.xlu0 %v179_v25  ;;  %194 = vperm.xlu2 %286, %v183_v45  }
 0x13c   :  { %201 = vperm.xlu1 %285, %v196_v47  }
 0x143   :  { %220 = vperm.xlu0 %288, %v209_v48   ;;  %207 = vperm.xlu2 %286, %v196_v47  }
 0x144   :  { %214 = vperm.xlu1 %285, %v209_v48  }
 0x18d   :  { %v182_v49 = vpop.permute.xlu2 %181 }
 0x18e   :  { %v224_v50 = vmul.f32 %v182_v49, %v419_v13  ;;  %v225_v51 = vmul.f32 %v182_v49, %v421_v14 }
 0x190   :  { %240 = vst [vmem:[#allocation7 + $0x10] sm:$0xff] %v224_v50 }
 0x191   :  { %241 = vst [vmem:[#allocation7 + $0x18] sm:$0xff] %v225_v51 }
 0x195   :  { %v195_v52 = vpop.permute.xlu2 %194 }
 0x196   :  { %v228_v53 = vmul.f32 %v195_v52, %v415_v11  ;;  %v229_v54 = vmul.f32 %v195_v52, %v417_v12 }
 0x198   :  { %244 = vst [vmem:[#allocation7 + $0x30] sm:$0xff] %v228_v53 }
 0x199   :  { %245 = vst [vmem:[#allocation7 + $0x38] sm:$0xff] %v229_v54 }
 0x19d   :  { %v208_v55 = vpop.permute.xlu2 %207 }
 0x19e   :  { %v232_v56 = vmul.f32 %v208_v55, %v411_v9  ;;  %v233_v57 = vmul.f32 %v208_v55, %v413_v10 }
 0x1a0   :  { %248 = vst [vmem:[#allocation7 + $0x50] sm:$0xff] %v232_v56 }
 0x1a1   :  { %249 = vst [vmem:[#allocation7 + $0x58] sm:$0xff] %v233_v57 }
 0x1a5   :  { %v189_v58 = vpop.permute.xlu0 %188 }
 0x1a6   :  { %v226_v13 = vmul.f32 %v189_v58, %v397_v2  ;;  %v227_v14 = vmul.f32 %v189_v58, %v401_v4  ;;  %v176_v59 = vpop.permute.xlu1 %175 }
 0x1a7   :  { %v222_v60 = vmul.f32 %v176_v59, %v403_v5  ;;  %v223_v11 = vmul.f32 %v176_v59, %v405_v6 }
 0x1a8   :  { %242 = vst [vmem:[#allocation7 + $0x20] sm:$0xff] %v226_v13 }
 0x1a9   :  { %243 = vst [vmem:[#allocation7 + $0x28] sm:$0xff] %v227_v14 }
 0x1aa   :  { %238 = vst [vmem:[#allocation7] sm:$0xff] %v222_v60 }
 0x1ab   :  { %239 = vst [vmem:[#allocation7 + $0x8] sm:$0xff] %v223_v11 }
 0x1ae   :  { %v202_v12 = vpop.permute.xlu1 %201 }
 0x1af   :  { %v230_v9 = vmul.f32 %v202_v12, %v393_v0  ;;  %v231_v10 = vmul.f32 %v202_v12, %v395_v1 }
 0x1b1   :  { %246 = vst [vmem:[#allocation7 + $0x40] sm:$0xff] %v230_v9 }
 0x1b2   :  { %247 = vst [vmem:[#allocation7 + $0x48] sm:$0xff] %v231_v10 }
 0x1b5   :  { %v221_v61 = vpop.permute.xlu0 %220 }
 0x1b6   :  { %v236_v2 = vmul.f32 %v221_v61, %v429_v18  ;;  %v237_v4 = vmul.f32 %v221_v61, %v431_v19  ;;  %v215_v62 = vpop.permute.xlu1 %214 }
 0x1b7   :  { %v234_v5 = vmul.f32 %v215_v62, %v433_v20  ;;  %v235_v0 = vmul.f32 %v215_v62, %v435_v21 }
 0x1b8   :  { %252 = vst [vmem:[#allocation7 + $0x70] sm:$0xff] %v236_v2 }
 0x1b9   :  { %253 = vst [vmem:[#allocation7 + $0x78] sm:$0xff] %v237_v4 }
 0x1ba   :  { %250 = vst [vmem:[#allocation7 + $0x60] sm:$0xff] %v234_v5 }
 0x1bb   :  { %251 = vst [vmem:[#allocation7 + $0x68] sm:$0xff] %v235_v0 }
 0x1bc   :  { %266 = dma.vmem_to_hbm [thread:$0]  %s259_s24, 2048, %s261_s27, [#allocation4], %s363_s18, %s363_s18, %s364_s19  }
 0x1bd   :  { %359 = dma.done.wait [#allocation4], 2048  }
 0x1be   :  { %360 = vsyncadd [#allocation4], 4294965248 }
 0x1bf   :  { %271 = vsyncpa [#allocation3], 1 }
 0x1c0   :  { %272 = vsyncpa [#allocation4], 1 }
 0x1c1   :  { %273 = vsyncpa [#allocation5], 1 }

</bundles_post_ra>
